<compile_context>
chip_gen: v6e
topology: v6e:2x2x1
jax: 0.10.0
libtpu: 0.0.40
codegen_flags: <defaults>
</compile_context>

<pallas_src>
import jax
import jax.numpy as jnp
from jax import lax
from jax.experimental import pallas as pl
from jax.experimental.pallas import tpu as pltpu


def _round_up(x: int, m: int) -> int:
    return ((x + m - 1) // m) * m


def _linear_kernel(x_ref, w_ref, o_ref, acc_ref):
    # Grid = (M-tiles, N-tiles, K-tiles); K (reduction) is the last / innermost axis.
    k = pl.program_id(2)

    @pl.when(k == 0)
    def _():
        acc_ref[...] = jnp.zeros_like(acc_ref)

    # x tile: (tm, tk); w tile: (tn, tk)  -> contract both over their last dim (K).
    acc_ref[...] += lax.dot_general(
        x_ref[...],
        w_ref[...],
        dimension_numbers=(((1,), (1,)), ((), ())),
        preferred_element_type=jnp.float32,
    )

    @pl.when(k == pl.num_programs(2) - 1)
    def _():
        o_ref[...] = acc_ref[...].astype(o_ref.dtype)


def linear_forward(x, weight, *, tm=256, tn=256, tk=512):
    """x: (M, K); weight: (N, K)  (torch nn.Linear layout).  Returns (M, N) = x @ W.T."""
    M, K = x.shape
    N, K2 = weight.shape
    assert K == K2, "input_dim mismatch between x and weight"

    # Clamp tiles to the (alignment-rounded) problem size so small layers use one tile.
    tm = min(tm, _round_up(M, 8))
    tn = min(tn, _round_up(N, 128))   # lane-dense output tile (>=128 in the last dim)
    tk = min(tk, _round_up(K, 128))

    Mp, Np, Kp = _round_up(M, tm), _round_up(N, tn), _round_up(K, tk)

    # Zero-pad to tile multiples (zeros in K contribute nothing to the dot).
    x_p = x if (Mp == M and Kp == K) else jnp.pad(x, ((0, Mp - M), (0, Kp - K)))
    w_p = weight if (Np == N and Kp == K) else jnp.pad(weight, ((0, Np - N), (0, Kp - K)))

    grid = (Mp // tm, Np // tn, Kp // tk)

    out_p = pl.pallas_call(
        _linear_kernel,
        out_shape=jax.ShapeDtypeStruct((Mp, Np), x.dtype),
        grid_spec=pltpu.PrefetchScalarGridSpec(
            num_scalar_prefetch=0,
            grid=grid,
            in_specs=[
                pl.BlockSpec((tm, tk), lambda i, j, k: (i, k)),   # x tile
                pl.BlockSpec((tn, tk), lambda i, j, k: (j, k)),   # weight tile (native N,K)
            ],
            out_specs=pl.BlockSpec((tm, tn), lambda i, j, k: (i, j)),
            scratch_shapes=[pltpu.VMEM((tm, tn), jnp.float32)],
        ),
        compiler_params=pltpu.CompilerParams(
            dimension_semantics=("parallel", "parallel", "arbitrary"),
        ),
    )(x_p, w_p)

    # Strip the padding back off.
    if Mp != M or Np != N:
        out_p = out_p[:M, :N]
    return out_p


if __name__ == "__main__":
    # Small shapes consistent with the module: batch=8, input_dim=32, output_dim=16
    batch, input_dim, output_dim = 8, 32, 16

    key = jax.random.PRNGKey(0)
    kx, kw = jax.random.split(key)

    x = jax.random.normal(kx, (batch, input_dim), dtype=jnp.float32)
    # Deterministic init mimicking nn.Linear's uniform(-1/sqrt(in), 1/sqrt(in))
    bound = 1.0 / (input_dim ** 0.5)
    weight = jax.random.uniform(
        kw, (output_dim, input_dim), dtype=jnp.float32, minval=-bound, maxval=bound
    )

    out = linear_forward(x, weight)
    out = jax.block_until_ready(out)

    # Correctness check against plain-JAX reference.
    ref = x @ weight.T
    assert out.shape == (batch, output_dim)
    assert jnp.allclose(out, ref, atol=1e-5, rtol=1e-5)

    print("KERNEL_OK")
</pallas_src>

<mosaic_0001>
module attributes {stable_mosaic.version = 11 : i64} {
  func.func @_linear_kernel(%arg0: i32, %arg1: i32, %arg2: i32, %arg3: memref<8x128xf32, #tpu.memory_space<vmem>>, %arg4: memref<128x128xf32, #tpu.memory_space<vmem>>, %arg5: memref<8x128xf32, #tpu.memory_space<vmem>>, %arg6: memref<8x128xf32, #tpu.memory_space<vmem>>) attributes {dimension_semantics = [#tpu.dimension_semantics<parallel>, #tpu.dimension_semantics<parallel>, #tpu.dimension_semantics<arbitrary>], iteration_bounds = array<i64: 1, 1, 1>, scalar_prefetch = 0 : i64, scratch_operands = 1 : i64, tpu.core_type = #tpu.core_type<tc>, window_params = [{transform_indices = @transform_0, window_bounds = array<i64: 8, 128>}, {transform_indices = @transform_1, window_bounds = array<i64: 128, 128>}, {transform_indices = @transform_2, window_bounds = array<i64: 8, 128>}]} {
    %c0_i32 = arith.constant 0 : i32
    %0 = arith.cmpi eq, %arg2, %c0_i32 : i32
    %1 = arith.extui %0 : i1 to i32
    %c0_i32_0 = arith.constant 0 : i32
    %2 = arith.cmpi ne, %1, %c0_i32_0 : i32
    scf.if %2 {
      %cst_10 = arith.constant 0.000000e+00 : f32
      %12 = vector.broadcast %cst_10 : f32 to vector<8x128xf32>
      %c0_11 = arith.constant 0 : index
      %c0_12 = arith.constant 0 : index
      %13 = vector.load %arg6[%c0_11, %c0_12] : memref<8x128xf32, #tpu.memory_space<vmem>>, vector<8x128xf32>
      tpu.vector_store %arg6[%c0_11, %c0_12], %12 {strides = array<i32>} : memref<8x128xf32, #tpu.memory_space<vmem>>, vector<8x128xf32>,
    } else {
    }
    %c0 = arith.constant 0 : index
    %c0_1 = arith.constant 0 : index
    %3 = vector.load %arg6[%c0, %c0_1] : memref<8x128xf32, #tpu.memory_space<vmem>>, vector<8x128xf32>
    %c0_2 = arith.constant 0 : index
    %c0_3 = arith.constant 0 : index
    %4 = vector.load %arg3[%c0_2, %c0_3] : memref<8x128xf32, #tpu.memory_space<vmem>>, vector<8x128xf32>
    %c0_4 = arith.constant 0 : index
    %c0_5 = arith.constant 0 : index
    %5 = vector.load %arg4[%c0_4, %c0_5] : memref<128x128xf32, #tpu.memory_space<vmem>>, vector<128x128xf32>
    %cst = arith.constant dense<0.000000e+00> : vector<8x128xf32>
    %6 = tpu.matmul %4, %5, %cst {dimension_numbers = #tpu.dot_dimension_numbers<[1], [1], [0], [0], [0, 0, 1, 0], [], []>} : vector<8x128xf32>, vector<128x128xf32>, vector<8x128xf32> -> vector<8x128xf32>
    %7 = arith.addf %3, %6 : vector<8x128xf32>
    %c0_6 = arith.constant 0 : index
    %c0_7 = arith.constant 0 : index
    %8 = vector.load %arg6[%c0_6, %c0_7] : memref<8x128xf32, #tpu.memory_space<vmem>>, vector<8x128xf32>
    tpu.vector_store %arg6[%c0_6, %c0_7], %7 {strides = array<i32>} : memref<8x128xf32, #tpu.memory_space<vmem>>, vector<8x128xf32>,
    %c0_i32_8 = arith.constant 0 : i32
    %9 = arith.cmpi eq, %arg2, %c0_i32_8 : i32
    %10 = arith.extui %9 : i1 to i32
    %c0_i32_9 = arith.constant 0 : i32
    %11 = arith.cmpi ne, %10, %c0_i32_9 : i32
    scf.if %11 {
      %c0_10 = arith.constant 0 : index
      %c0_11 = arith.constant 0 : index
      %12 = vector.load %arg6[%c0_10, %c0_11] : memref<8x128xf32, #tpu.memory_space<vmem>>, vector<8x128xf32>
      %c0_12 = arith.constant 0 : index
      %c0_13 = arith.constant 0 : index
      %13 = vector.load %arg5[%c0_12, %c0_13] : memref<8x128xf32, #tpu.memory_space<vmem>>, vector<8x128xf32>
      tpu.vector_store %arg5[%c0_12, %c0_13], %12 {strides = array<i32>} : memref<8x128xf32, #tpu.memory_space<vmem>>, vector<8x128xf32>,
    } else {
    }
    return
  }
  func.func @transform_0(%arg0: i32, %arg1: i32, %arg2: i32) -> (i32, i32) {
    %c0_i32 = arith.constant 0 : i32
    return %arg0, %arg2 : i32, i32
  }
  func.func @transform_1(%arg0: i32, %arg1: i32, %arg2: i32) -> (i32, i32) {
    %c0_i32 = arith.constant 0 : i32
    return %arg1, %arg2 : i32, i32
  }
  func.func @transform_2(%arg0: i32, %arg1: i32, %arg2: i32) -> (i32, i32) {
    %c0_i32 = arith.constant 0 : i32
    return %arg0, %arg1 : i32, i32
  }
}

</mosaic_0001>

<bundles_post_ra>
// kernel: tpu_custom_call.1
= control target key start
LH: loop header
LB: loop body
LE: loop exit
PB: predicated region body
PF: predicated region fallthrough
CT: control target
= control target key end

     0   :  { %7 = vsyncpa [#allocation4], 0  ;;  %s310_s0 = inlined_call_operand.hbm [shape: f32[8,128], index: 0, kind: input, shape index: {}]   ;;  %s311_s1 = inlined_call_operand.hbm [shape: f32[128,128], index: 1, kind: input, shape index: {}]   ;;  %s312_s2 = inlined_call_operand.hbm [shape: f32[8,128], index: 2, kind: output, shape index: {}]  }
   0x1   :  { %8 = vsyncpa [#allocation7], 0 }
   0x2   :  { %9 = vsyncpa [#allocation5], 0  ;;  %s279_s9 = smov [#allocation3]   ;;  %s280_s11 = smov [#allocation6]  }
   0x3   :  { %s16_s10 = sshll.u32 %s279_s9, 4  ;;  %s25_s12 = sshll.u32 %s280_s11, 4  ;;  %s17_s10 = int_to_ptr.vmem [resolvable:$true] %s16_s10  ;;  %s26_s12 = int_to_ptr.vmem [resolvable:$true] %s25_s12 }
   0x4   :  { %s221_s13 = scalar_lea.vmem %s17_s10, 128  ;;  %p226_p1 = scmp.lt.s32.totalorder %s17_s10, %s17_s10 }
   0x5   :  { %p222_p0 = scmp.ne.s32.totalorder %s17_s10, %s221_s13  ;;  %p227_p2 = scmp.lt.s32.totalorder %s221_s13, %s221_s13 }
   0x7   :  { %p228_p3 = por %p227_p2, %p226_p1 }
   0x9   :  { %p229_p4 = pnand %p228_p3, %p222_p0 }
   0xb   :  { %232 = shalt.err (!%p229_p4)
}
   0xc   :  { %19 = dma.hbm_to_vmem [thread:$0]  %s310_s0, 128, %s17_s10, [#allocation4]  }
   0xd   :  { %s241_s16 = scalar_lea.vmem %s26_s12, 2048  ;;  %p246_p6 = scmp.lt.s32.totalorder %s26_s12, %s26_s12 }
   0xe   :  { %p242_p5 = scmp.ne.s32.totalorder %s26_s12, %s241_s16  ;;  %p247_p7 = scmp.lt.s32.totalorder %s241_s16, %s241_s16 }
  0x10   :  { %p248_p8 = por %p247_p7, %p246_p6 }
  0x12   :  { %p249_p9 = pnand %p248_p8, %p242_p5 }
  0x14   :  { %252 = shalt.err (!%p249_p9)
}
  0x15   :  { %s281_s17 = smov 128   ;;  %s282_s18 = smov 8  }
  0x16   :  { %31 = dma.hbm_to_vmem [thread:$0]  %s311_s1, 2048, %s26_s12, [#allocation7], %s281_s17, %s281_s17, %s282_s18  }
  0x17   :  { %273 = dma.done.wait [#allocation4], 128  }
  0x18   :  { %274 = vsyncadd [#allocation4], 4294967168 }
  0x19   :  { %275 = dma.done.wait [#allocation7], 2048  }
  0x1a   :  { %276 = vsyncadd [#allocation7], 4294965248  ;;  %v283_v0 = vmov 0.0   ;;  %vm284_vm0 = vmmov 0   ;;  %v60_v1 = vld [vmem:[#allocation6 + $0x78] sm:$0xff]  ;;  %v59_v2 = vld [vmem:[#allocation6 + $0x70] sm:$0xff] }
  0x1b   :  { %171 = vmatprep.subr.mxu0 %v283_v0  ;;  %203 = vmatprep.mubr.msk.f32.mxu0 %vm284_vm0, %v283_v0  ;;  %v58_v3 = vld [vmem:[#allocation6 + $0x68] sm:$0xff]  ;;  %v57_v4 = vld [vmem:[#allocation6 + $0x60] sm:$0xff]  ;;  %v56_v5 = vld [vmem:[#allocation6 + $0x58] sm:$0xff]  ;;  %s285_s0 = smov [#allocation8]  }
  0x1c   :  { %172 = vmatpush3.xpose.msra.mxu0 %v60_v1  ;;  %v55_v6 = vld [vmem:[#allocation6 + $0x50] sm:$0xff]  ;;  %v54_v7 = vld [vmem:[#allocation6 + $0x48] sm:$0xff]  ;;  %v53_v8 = vld [vmem:[#allocation6 + $0x40] sm:$0xff]  ;;  %s144_s1 = sshll.u32 %s285_s0, 4  ;;  %s145_s1 = int_to_ptr.vmem [resolvable:$true] %s144_s1 }
  0x1d   :  { %173 = vmatprep.subr.mxu0 %v283_v0  ;;  %v52_v9 = vld [vmem:[#allocation6 + $0x38] sm:$0xff]  ;;  %v51_v10 = vld [vmem:[#allocation6 + $0x30] sm:$0xff]  ;;  %v50_v11 = vld [vmem:[#allocation6 + $0x28] sm:$0xff]  ;;  %s253_s21 = scalar_lea.vmem %s145_s1, 128  ;;  %p258_p11 = scmp.lt.s32.totalorder %s145_s1, %s145_s1 }
  0x1e   :  { %v49_v12 = vld [vmem:[#allocation6 + $0x20] sm:$0xff]  ;;  %v48_v13 = vld [vmem:[#allocation6 + $0x18] sm:$0xff]  ;;  %v47_v14 = vld [vmem:[#allocation6 + $0x10] sm:$0xff]  ;;  %p254_p10 = scmp.ne.s32.totalorder %s145_s1, %s253_s21  ;;  %p259_p12 = scmp.lt.s32.totalorder %s253_s21, %s253_s21 }
  0x1f   :  { %v46_v15 = vld [vmem:[#allocation6 + $0x8] sm:$0xff]  ;;  %v45_v16 = vld [vmem:[#allocation6] sm:$0xff]  ;;  %v44_v17 = vld [vmem:[#allocation3] sm:$0xff] }
  0x20   :  { %174 = vmatpush3.xpose.msra.mxu0 %v59_v2  ;;  %p260_p13 = por %p259_p12, %p258_p11 }
  0x21   :  { %175 = vmatprep.subr.mxu0 %v283_v0 }
  0x22   :  { %p261_p0 = pnand %p260_p13, %p254_p10 }
  0x24   :  { %176 = vmatpush3.xpose.msra.mxu0 %v58_v3 }
  0x25   :  { %177 = vmatprep.subr.mxu0 %v283_v0 }
  0x28   :  { %178 = vmatpush3.xpose.msra.mxu0 %v57_v4 }
  0x29   :  { %179 = vmatprep.subr.mxu0 %v283_v0 }
  0x2c   :  { %180 = vmatpush3.xpose.msra.mxu0 %v56_v5 }
  0x2d   :  { %181 = vmatprep.subr.mxu0 %v283_v0 }
  0x30   :  { %182 = vmatpush3.xpose.msra.mxu0 %v55_v6 }
  0x31   :  { %183 = vmatprep.subr.mxu0 %v283_v0 }
  0x34   :  { %184 = vmatpush3.xpose.msra.mxu0 %v54_v7 }
  0x35   :  { %185 = vmatprep.subr.mxu0 %v283_v0 }
  0x38   :  { %186 = vmatpush3.xpose.msra.mxu0 %v53_v8 }
  0x39   :  { %187 = vmatprep.subr.mxu0 %v283_v0 }
  0x3c   :  { %188 = vmatpush3.xpose.msra.mxu0 %v52_v9 }
  0x3d   :  { %189 = vmatprep.subr.mxu0 %v283_v0 }
  0x40   :  { %190 = vmatpush3.xpose.msra.mxu0 %v51_v10 }
  0x41   :  { %191 = vmatprep.subr.mxu0 %v283_v0 }
  0x44   :  { %192 = vmatpush3.xpose.msra.mxu0 %v50_v11 }
  0x45   :  { %193 = vmatprep.subr.mxu0 %v283_v0 }
  0x48   :  { %194 = vmatpush3.xpose.msra.mxu0 %v49_v12 }
  0x49   :  { %195 = vmatprep.subr.mxu0 %v283_v0 }
  0x4c   :  { %196 = vmatpush3.xpose.msra.mxu0 %v48_v13 }
  0x4d   :  { %197 = vmatprep.subr.mxu0 %v283_v0 }
  0x50   :  { %198 = vmatpush3.xpose.msra.mxu0 %v47_v14 }
  0x51   :  { %199 = vmatprep.subr.mxu0 %v283_v0 }
  0x54   :  { %200 = vmatpush3.xpose.msra.mxu0 %v46_v15 }
  0x55   :  { %201 = vmatprep.subr.mxu0 %v283_v0 }
  0x58   :  { %202 = vmatpush3.xpose.msra.mxu0 %v45_v16 }
  0x5b   :  { %204 = vmatmul.mubr.f32.vlgmr.msra.gmra.mxu0 %v44_v17 }
 0x11b   :  { %v127_v18 = vpop.f32.mrf.mxu0 }
 0x11c   :  { %137 = vst [vmem:[#allocation8] sm:$0xff] %v127_v18 }
 0x11d   :  { %v205_v19 = vpop.f32.mrf.mxu0 }
 0x11e   :  { %264 = shalt.err (!%p261_p0)
}
 0x11f   :  { %147 = dma.vmem_to_hbm [thread:$0]  %s145_s1, 128, %s312_s2, [#allocation5]  }
 0x120   :  { %277 = dma.done.wait [#allocation5], 128  }
 0x121   :  { %278 = vsyncadd [#allocation5], 4294967168 }
 0x122   :  { %151 = vsyncpa [#allocation4], 1 }
 0x123   :  { %152 = vsyncpa [#allocation7], 1 }
 0x124   :  { %153 = vsyncpa [#allocation5], 1 }

</bundles_post_ra>
